<compile_context>
chip_gen: v5e
topology: v5e:2x2
jax: 0.10.0
libtpu: 0.0.40
codegen_flags: <defaults>
</compile_context>

<pallas_src>
import functools

import jax
import jax.numpy as jnp
from jax import lax
from jax.experimental import pallas as pl
from jax.experimental.pallas import tpu as pltpu


def membership_kernel(act_ref, fid_ref, ids_ref, denom_ref, emb_ref,
                      ww_ref, wb_ref, cwt_ref, cbt_ref, lab_ref,
                      loss_ref, preds_ref, acc_ref,
                      *, num_batch, count_dtype, unroll):
    R, S = ids_ref.shape          # R = 6 * B (6 text fields stacked)
    TV, H = emb_ref.shape         # vocab tile x hidden
    B = num_batch
    k = pl.program_id(0)
    nk = pl.num_programs(0)

    @pl.when(k == 0)
    def _():
        acc_ref[...] = jnp.zeros_like(acc_ref)

    # ---- pooling phase: masked token counts -> one MXU matmul per tile ----
    # Skipped entirely for vocab tiles that contain no valid token; their emb
    # block index is pinned to the last active tile, so no DMA is issued.
    @pl.when(act_ref[k] != 0)
    def _():
        ids = ids_ref[...]                                    # [R,S] f32 (-1 == masked)
        v_row = (lax.broadcasted_iota(jnp.int32, (1, TV), 1)
                 + k * TV).astype(jnp.float32)                # [1,TV]
        s_row = lax.broadcasted_iota(jnp.int32, (1, S), 1)    # [1,S]

        def body(s, counts):
            # Column s of the masked-id matrix via a static lane-select +
            # lane reduction (avoids dynamic minor-dim slicing).
            col = jnp.sum(jnp.where(s_row == s, ids, 0.0),
                          axis=1, keepdims=True)              # [R,1]
            hit = col == v_row                                # [R,TV]
            return counts + hit.astype(count_dtype)

        counts = lax.fori_loop(0, S, body,
                               jnp.zeros((R, TV), count_dtype),
                               unroll=unroll)
        # bf16 x bf16 -> f32 MXU matmul; counts are exact small integers.
        acc_ref[...] += jnp.dot(counts.astype(jnp.bfloat16), emb_ref[...],
                                preferred_element_type=jnp.float32)

    # ---- epilogue: fusion, classifier, loss, argmax ----
    @pl.when(k == nk - 1)
    def _():
        inv = pl.reciprocal(denom_ref[...], approx=False)     # [R,1]
        pooled = acc_ref[...] * inv                           # [R,H] masked mean

        # Row layout: [inst; ent; inst_lbl; ent_lbl; inst_ann; ent_ann].
        # name_label == 'both': name + label; both fuse() calls batched.
        a_all = pooled[0:2 * B] + pooled[2 * B:4 * B]         # [2B,H]
        ann_all = pooled[4 * B:6 * B]                         # [2B,H]

        ww = ww_ref[...]                                      # [2H,H]
        wb = wb_ref[...]                                      # [1,H]
        gate = jax.nn.sigmoid(
            jnp.dot(a_all, ww[:H, :], preferred_element_type=jnp.float32)
            + jnp.dot(ann_all, ww[H:, :], preferred_element_type=jnp.float32)
            + wb)
        merged = a_all + gate * a_all + (1.0 - gate) * ann_all   # [2B,H]
        inst_m = merged[:B]
        ent_m = merged[B:]

        # Classifier in transposed [2, B] orientation so loss/preds stay
        # lane-dense.  dropout: identity (eval mode).
        cwt = cwt_ref[...]                                    # [2,2H] (torch layout)
        cbt = cbt_ref[...]                                    # [2,1]
        dn = (((1,), (1,)), ((), ()))                         # contract on H
        logits_t = (
            lax.dot_general(cwt[:, :H], inst_m, dn,
                            preferred_element_type=jnp.float32)
            + lax.dot_general(cwt[:, H:], ent_m, dn,
                              preferred_element_type=jnp.float32)
            + cbt)                                            # [2,B]
        l0 = logits_t[0:1, :]
        l1 = logits_t[1:2, :]

        # CrossEntropyLoss (mean): select the true-class logit (no one-hot).
        lab = lab_ref[...]                                    # [1,B] int32
        mrow = jnp.maximum(l0, l1)
        lse = mrow + jnp.log(jnp.exp(l0 - mrow) + jnp.exp(l1 - mrow))
        picked = jnp.where(lab == 1, l1, l0)
        loss_ref[...] = jnp.sum(lse - picked, axis=1, keepdims=True) / float(B)

        # argmax over 2 classes (first-max tie-break), lane-dense [1,B].
        preds_ref[...] = (l1 > l0).astype(jnp.int32)


def _tpu_tuning():
    """Per-generation dtype / VMEM choices."""
    try:
        kind = jax.devices()[0].device_kind.lower()
    except Exception:
        kind = ""
    is_v5 = "v5" in kind
    is_v7 = "v7" in kind
    count_dtype = jnp.float32 if is_v5 else jnp.bfloat16   # v5e VPU has no bf16 path
    vmem_limit = (48 if is_v7 else 64) * 1024 * 1024       # v7x: 64 MiB physical VMEM
    return count_dtype, vmem_limit


def model4membership_forward(params, ids_stacked, mask_stacked, label_ids,
                             mode="eval", vocab_tile=512):
    """Pallas-backed forward. ids_stacked/mask_stacked: [6, B, S]."""
    F, B, S = ids_stacked.shape
    assert F == 6
    V, H = params["emb"].shape
    R = F * B

    count_dtype, vmem_limit = _tpu_tuning()
    if S > 256:
        count_dtype = jnp.float32        # keep integer counts exact beyond bf16 range

    # Vocab tile: multiple of 128 lanes (counts lane dim & MXU K dim), capped so
    # double-buffered bf16 emb tile + count temporaries + acc fit the VMEM budget.
    TV = max(128, (min(vocab_tile, max(V, 128)) // 128) * 128)
    ct_bytes = jnp.dtype(count_dtype).itemsize
    budget = vmem_limit // 2
    while TV > 128 and (2 * TV * H * 2 + 2 * R * TV * ct_bytes + R * H * 4) > budget:
        TV -= 128
    Vp = ((V + TV - 1) // TV) * TV
    nk = Vp // TV

    # Stream the embedding table in bf16 (halves HBM traffic); padded rows are
    # zero and never indexed.
    emb = params["emb"].astype(jnp.bfloat16)
    if Vp != V:
        emb = jnp.pad(emb, ((0, Vp - V), (0, 0)))

    mask2d = mask_stacked.reshape(R, S).astype(jnp.float32)
    ids_raw = ids_stacked.reshape(R, S).astype(jnp.int32)
    # Fold the 0/1 attention mask into the ids: masked positions get -1, which
    # never matches a vocab row, so no per-position mask multiply in-kernel.
    ids2d = jnp.where(mask2d > 0, ids_raw.astype(jnp.float32), -1.0)
    denom = jnp.sum(mask2d, axis=1, keepdims=True)            # [R,1] mean-pool denominator
    lab_row = label_ids.reshape(1, B).astype(jnp.int32)

    # Per-vocab-tile activity (scalar-prefetched): empty tiles are skipped and
    # their emb block index pinned to the last active tile (no DMA, no compute).
    valid = ids2d >= 0
    buckets = jnp.where(valid, ids_raw // TV, 0).reshape(-1)
    hits = jnp.bincount(buckets, weights=valid.reshape(-1).astype(jnp.float32),
                        length=nk)
    active = (hits > 0).astype(jnp.int32)
    fetch_idx = lax.cummax(
        jnp.where(active > 0, jnp.arange(nk, dtype=jnp.int32), 0))

    def const2d(shape):
        return pl.BlockSpec(shape, lambda k, act, fid: (0, 0))

    grid_spec = pltpu.PrefetchScalarGridSpec(
        num_scalar_prefetch=2,
        grid=(nk,),
        in_specs=[
            const2d((R, S)),                                       # masked token ids (f32)
            const2d((R, 1)),                                       # mean-pool denominators
            pl.BlockSpec((TV, H), lambda k, act, fid: (fid[k], 0)),  # emb tile (skip-aware)
            const2d((2 * H, H)),                                   # W weight (x @ W form)
            const2d((1, H)),                                       # W bias
            const2d((2, 2 * H)),                                   # classifier weight
            const2d((2, 1)),                                       # classifier bias
            const2d((1, B)),                                       # labels (lane-dense)
        ],
        out_specs=(const2d((1, 1)), const2d((1, B))),
        scratch_shapes=[pltpu.VMEM((R, H), jnp.float32)],          # pooled-sum accumulator
    )

    kernel = functools.partial(membership_kernel, num_batch=B,
                               count_dtype=count_dtype, unroll=min(8, S))

    loss, preds = pl.pallas_call(
        kernel,
        out_shape=(jax.ShapeDtypeStruct((1, 1), jnp.float32),
                   jax.ShapeDtypeStruct((1, B), jnp.int32)),
        grid_spec=grid_spec,
        compiler_params=pltpu.CompilerParams(
            dimension_semantics=("arbitrary",),                    # vocab axis = reduction
            vmem_limit_bytes=vmem_limit),
    )(active, fetch_idx, ids2d, denom, emb, params["W_w"], params["W_b"],
      params["cls_wt"], params["cls_bt"], lab_row)

    loss = loss[0, 0]
    if mode == "train":
        return loss
    return loss, preds[0], label_ids


def _reference_forward(params, ids_stacked, mask_stacked, label_ids):
    """Pure-JAX reference reproducing the PyTorch forward semantics.

    The kernel streams the embedding table in bf16 (perf feedback), so the
    reference uses the identically-rounded table; all other math is f32.
    """
    emb = params["emb"].astype(jnp.bfloat16).astype(jnp.float32)

    def pool(i):
        ids = ids_stacked[i]
        mask = mask_stacked[i].astype(jnp.float32)
        e = emb[ids]                                          # [B,S,H]
        summed = jnp.sum(e * mask[:, :, None], axis=1)
        return summed / jnp.sum(mask, axis=1, keepdims=True)

    inst = pool(0) + pool(2)
    ent = pool(1) + pool(3)
    inst_ann, ent_ann = pool(4), pool(5)

    def fuse(a, ann):
        comb = jnp.concatenate([a, ann], axis=1)
        gate = jax.nn.sigmoid(comb @ params["W_w"] + params["W_b"])
        return a + (gate * a + (1 - gate) * ann)

    seq = jnp.concatenate([fuse(inst, inst_ann), fuse(ent, ent_ann)], axis=1)
    logits = seq @ params["cls_wt"].T + params["cls_bt"][:, 0]
    logp = jax.nn.log_softmax(logits, axis=-1)
    loss = -jnp.mean(jnp.take_along_axis(logp, label_ids[:, None], axis=1))
    return loss, jnp.argmax(logits, axis=-1)


if __name__ == "__main__":
    key = jax.random.PRNGKey(0)
    V, H, B, S = 300, 32, 2, 8          # vocab, hidden_size, batch, seq len

    k = jax.random.split(key, 8)
    params = {
        "emb":    jax.random.normal(k[0], (V, H), jnp.float32) * 0.1,
        "W_w":    jax.random.normal(k[1], (2 * H, H), jnp.float32) * 0.1,
        "W_b":    jax.random.normal(k[2], (1, H), jnp.float32) * 0.1,
        "cls_wt": jax.random.normal(k[3], (2, 2 * H), jnp.float32) * 0.1,
        "cls_bt": jax.random.normal(k[4], (2, 1), jnp.float32) * 0.1,
    }
    # TODO(synk): merge_1 / merge_2 Linear layers exist in __init__ but are
    # unused in forward(); they are intentionally not materialized.

    ids_stacked = jax.random.randint(k[5], (6, B, S), 0, V, jnp.int32)
    lengths = jax.random.randint(k[6], (6, B), 1, S + 1, jnp.int32)
    pos = lax.broadcasted_iota(jnp.int32, (6, B, S), 2)
    mask_stacked = (pos < lengths[:, :, None]).astype(jnp.float32)
    label_ids = jax.random.randint(k[7], (B,), 0, 2, jnp.int32)

    # vocab_tile=128 -> 3 vocab tiles (Vp=384), exercising vocab-padding,
    # grid accumulation and the empty-tile skip machinery at toy sizes.
    loss, preds, labels = model4membership_forward(
        params, ids_stacked, mask_stacked, label_ids, mode="eval",
        vocab_tile=128)
    jax.block_until_ready((loss, preds, labels))

    ref_loss, ref_preds = _reference_forward(
        params, ids_stacked, mask_stacked, label_ids)
    assert jnp.allclose(loss, ref_loss, atol=1e-4, rtol=1e-4), (loss, ref_loss)
    assert jnp.array_equal(preds, ref_preds), (preds, ref_preds)

    print("KERNEL_OK")
</pallas_src>

<mosaic_0001>
module attributes {stable_mosaic.version = 11 : i64} {
  func.func @membership_kernel(%arg0: i32, %arg1: memref<3xi32, #tpu.memory_space<smem>>, %arg2: memref<3xi32, #tpu.memory_space<smem>>, %arg3: memref<12x8xf32, #tpu.memory_space<vmem>>, %arg4: memref<12x1xf32, #tpu.memory_space<vmem>>, %arg5: memref<128x32xbf16, #tpu.memory_space<vmem>>, %arg6: memref<64x32xf32, #tpu.memory_space<vmem>>, %arg7: memref<1x32xf32, #tpu.memory_space<vmem>>, %arg8: memref<2x64xf32, #tpu.memory_space<vmem>>, %arg9: memref<2x1xf32, #tpu.memory_space<vmem>>, %arg10: memref<1x2xi32, #tpu.memory_space<vmem>>, %arg11: memref<1x1xf32, #tpu.memory_space<vmem>>, %arg12: memref<1x2xi32, #tpu.memory_space<vmem>>, %arg13: memref<12x32xf32, #tpu.memory_space<vmem>>) attributes {dimension_semantics = [#tpu.dimension_semantics<arbitrary>], iteration_bounds = array<i64: 3>, scalar_prefetch = 2 : i64, scratch_operands = 1 : i64, tpu.core_type = #tpu.core_type<tc>, window_params = [{pipeline_mode = #tpu.pipeline_mode<synchronous>, transform_indices = @transform_0, window_bounds = array<i64: 12, 8>}, {pipeline_mode = #tpu.pipeline_mode<synchronous>, transform_indices = @transform_1, window_bounds = array<i64: 12, 1>}, {transform_indices = @transform_2, window_bounds = array<i64: 128, 32>}, {pipeline_mode = #tpu.pipeline_mode<synchronous>, transform_indices = @transform_3, window_bounds = array<i64: 64, 32>}, {pipeline_mode = #tpu.pipeline_mode<synchronous>, transform_indices = @transform_4, window_bounds = array<i64: 1, 32>}, {pipeline_mode = #tpu.pipeline_mode<synchronous>, transform_indices = @transform_5, window_bounds = array<i64: 2, 64>}, {pipeline_mode = #tpu.pipeline_mode<synchronous>, transform_indices = @transform_6, window_bounds = array<i64: 2, 1>}, {pipeline_mode = #tpu.pipeline_mode<synchronous>, transform_indices = @transform_7, window_bounds = array<i64: 1, 2>}, {pipeline_mode = #tpu.pipeline_mode<synchronous>, transform_indices = @transform_8, window_bounds = array<i64: 1, 1>}, {pipeline_mode = #tpu.pipeline_mode<synchronous>, transform_indices = @transform_9, window_bounds = array<i64: 1, 2>}]} {
    %c0_i32 = arith.constant 0 : i32
    %0 = arith.cmpi eq, %arg0, %c0_i32 : i32
    %1 = arith.extui %0 : i1 to i32
    %c0_i32_0 = arith.constant 0 : i32
    %2 = arith.cmpi ne, %1, %c0_i32_0 : i32
    scf.if %2 {
      %cst = arith.constant 0.000000e+00 : f32
      %11 = vector.broadcast %cst : f32 to vector<12x32xf32>
      %c0 = arith.constant 0 : index
      %c0_4 = arith.constant 0 : index
      %12 = vector.load %arg13[%c0, %c0_4] : memref<12x32xf32, #tpu.memory_space<vmem>>, vector<12x32xf32>
      tpu.vector_store %arg13[%c0, %c0_4], %11 {strides = array<i32>} : memref<12x32xf32, #tpu.memory_space<vmem>>, vector<12x32xf32>,
    } else {
    }
    %3 = arith.index_cast %arg0 : i32 to index
    %4 = memref.load %arg1[%3] : memref<3xi32, #tpu.memory_space<smem>>
    %c0_i32_1 = arith.constant 0 : i32
    %5 = arith.cmpi ne, %4, %c0_i32_1 : i32
    %6 = arith.extui %5 : i1 to i32
    %c0_i32_2 = arith.constant 0 : i32
    %7 = arith.cmpi ne, %6, %c0_i32_2 : i32
    scf.if %7 {
      %c0 = arith.constant 0 : index
      %c0_4 = arith.constant 0 : index
      %11 = vector.load %arg3[%c0, %c0_4] : memref<12x8xf32, #tpu.memory_space<vmem>>, vector<12x8xf32>
      %12 = tpu.iota {dimensions = array<i32: 1>} : vector<1x128xi32>
      %c128_i32 = arith.constant 128 : i32
      %13 = arith.muli %arg0, %c128_i32 : i32
      %14 = vector.broadcast %13 : i32 to vector<1x128xi32>
      %15 = arith.addi %12, %14 : vector<1x128xi32>
      %16 = arith.sitofp %15 : vector<1x128xi32> to vector<1x128xf32>
      %17 = tpu.iota {dimensions = array<i32: 1>} : vector<1x8xi32>
      %cst = arith.constant 0.000000e+00 : bf16
      %18 = vector.broadcast %cst : bf16 to vector<12x128xbf16>
      %c0_i32_5 = arith.constant 0 : i32
      %19 = vector.broadcast %c0_i32_5 : i32 to vector<1x8xi32>
      %20 = arith.cmpi eq, %17, %19 : vector<1x8xi32>
      %cst_6 = arith.constant 0.000000e+00 : f32
      %21 = vector.shape_cast %20 : vector<1x8xi1> to vector<1x8xi1>
      %22 = vector.broadcast %21 : vector<1x8xi1> to vector<12x8xi1>
      %23 = vector.broadcast %cst_6 : f32 to vector<12x8xf32>
      %24 = arith.select %22, %11, %23 : vector<12x8xi1>, vector<12x8xf32>
      %cst_7 = arith.constant dense<0.000000e+00> : vector<12xf32>
      %25 = vector.multi_reduction <add>, %24, %cst_7 [1] : vector<12x8xf32> to vector<12xf32>
      %26 = vector.shape_cast %25 : vector<12xf32> to vector<12x1xf32>
      %27 = vector.broadcast %26 : vector<12x1xf32> to vector<12x128xf32>
      %28 = vector.broadcast %16 : vector<1x128xf32> to vector<12x128xf32>
      %29 = arith.cmpf oeq, %27, %28 : vector<12x128xf32>
      %30 = arith.extui %29 : vector<12x128xi1> to vector<12x128xi32>
      %31 = arith.sitofp %30 : vector<12x128xi32> to vector<12x128xf32>
      %32 = arith.truncf %31 : vector<12x128xf32> to vector<12x128xbf16>
      %33 = arith.addf %18, %32 : vector<12x128xbf16>
      %c1_i32 = arith.constant 1 : i32
      %34 = vector.broadcast %c1_i32 : i32 to vector<1x8xi32>
      %35 = arith.cmpi eq, %17, %34 : vector<1x8xi32>
      %cst_8 = arith.constant 0.000000e+00 : f32
      %36 = vector.shape_cast %35 : vector<1x8xi1> to vector<1x8xi1>
      %37 = vector.broadcast %36 : vector<1x8xi1> to vector<12x8xi1>
      %38 = vector.broadcast %cst_8 : f32 to vector<12x8xf32>
      %39 = arith.select %37, %11, %38 : vector<12x8xi1>, vector<12x8xf32>
      %cst_9 = arith.constant dense<0.000000e+00> : vector<12xf32>
      %40 = vector.multi_reduction <add>, %39, %cst_9 [1] : vector<12x8xf32> to vector<12xf32>
      %41 = vector.shape_cast %40 : vector<12xf32> to vector<12x1xf32>
      %42 = vector.broadcast %41 : vector<12x1xf32> to vector<12x128xf32>
      %43 = vector.broadcast %16 : vector<1x128xf32> to vector<12x128xf32>
      %44 = arith.cmpf oeq, %42, %43 : vector<12x128xf32>
      %45 = arith.extui %44 : vector<12x128xi1> to vector<12x128xi32>
      %46 = arith.sitofp %45 : vector<12x128xi32> to vector<12x128xf32>
      %47 = arith.truncf %46 : vector<12x128xf32> to vector<12x128xbf16>
      %48 = arith.addf %33, %47 : vector<12x128xbf16>
      %c2_i32_10 = arith.constant 2 : i32
      %49 = vector.broadcast %c2_i32_10 : i32 to vector<1x8xi32>
      %50 = arith.cmpi eq, %17, %49 : vector<1x8xi32>
      %cst_11 = arith.constant 0.000000e+00 : f32
      %51 = vector.shape_cast %50 : vector<1x8xi1> to vector<1x8xi1>
      %52 = vector.broadcast %51 : vector<1x8xi1> to vector<12x8xi1>
      %53 = vector.broadcast %cst_11 : f32 to vector<12x8xf32>
      %54 = arith.select %52, %11, %53 : vector<12x8xi1>, vector<12x8xf32>
      %cst_12 = arith.constant dense<0.000000e+00> : vector<12xf32>
      %55 = vector.multi_reduction <add>, %54, %cst_12 [1] : vector<12x8xf32> to vector<12xf32>
      %56 = vector.shape_cast %55 : vector<12xf32> to vector<12x1xf32>
      %57 = vector.broadcast %56 : vector<12x1xf32> to vector<12x128xf32>
      %58 = vector.broadcast %16 : vector<1x128xf32> to vector<12x128xf32>
      %59 = arith.cmpf oeq, %57, %58 : vector<12x128xf32>
      %60 = arith.extui %59 : vector<12x128xi1> to vector<12x128xi32>
      %61 = arith.sitofp %60 : vector<12x128xi32> to vector<12x128xf32>
      %62 = arith.truncf %61 : vector<12x128xf32> to vector<12x128xbf16>
      %63 = arith.addf %48, %62 : vector<12x128xbf16>
      %c3_i32 = arith.constant 3 : i32
      %64 = vector.broadcast %c3_i32 : i32 to vector<1x8xi32>
      %65 = arith.cmpi eq, %17, %64 : vector<1x8xi32>
      %cst_13 = arith.constant 0.000000e+00 : f32
      %66 = vector.shape_cast %65 : vector<1x8xi1> to vector<1x8xi1>
      %67 = vector.broadcast %66 : vector<1x8xi1> to vector<12x8xi1>
      %68 = vector.broadcast %cst_13 : f32 to vector<12x8xf32>
      %69 = arith.select %67, %11, %68 : vector<12x8xi1>, vector<12x8xf32>
      %cst_14 = arith.constant dense<0.000000e+00> : vector<12xf32>
      %70 = vector.multi_reduction <add>, %69, %cst_14 [1] : vector<12x8xf32> to vector<12xf32>
      %71 = vector.shape_cast %70 : vector<12xf32> to vector<12x1xf32>
      %72 = vector.broadcast %71 : vector<12x1xf32> to vector<12x128xf32>
      %73 = vector.broadcast %16 : vector<1x128xf32> to vector<12x128xf32>
      %74 = arith.cmpf oeq, %72, %73 : vector<12x128xf32>
      %75 = arith.extui %74 : vector<12x128xi1> to vector<12x128xi32>
      %76 = arith.sitofp %75 : vector<12x128xi32> to vector<12x128xf32>
      %77 = arith.truncf %76 : vector<12x128xf32> to vector<12x128xbf16>
      %78 = arith.addf %63, %77 : vector<12x128xbf16>
      %c4_i32 = arith.constant 4 : i32
      %79 = vector.broadcast %c4_i32 : i32 to vector<1x8xi32>
      %80 = arith.cmpi eq, %17, %79 : vector<1x8xi32>
      %cst_15 = arith.constant 0.000000e+00 : f32
      %81 = vector.shape_cast %80 : vector<1x8xi1> to vector<1x8xi1>
      %82 = vector.broadcast %81 : vector<1x8xi1> to vector<12x8xi1>
      %83 = vector.broadcast %cst_15 : f32 to vector<12x8xf32>
      %84 = arith.select %82, %11, %83 : vector<12x8xi1>, vector<12x8xf32>
      %cst_16 = arith.constant dense<0.000000e+00> : vector<12xf32>
      %85 = vector.multi_reduction <add>, %84, %cst_16 [1] : vector<12x8xf32> to vector<12xf32>
      %86 = vector.shape_cast %85 : vector<12xf32> to vector<12x1xf32>
      %87 = vector.broadcast %86 : vector<12x1xf32> to vector<12x128xf32>
      %88 = vector.broadcast %16 : vector<1x128xf32> to vector<12x128xf32>
      %89 = arith.cmpf oeq, %87, %88 : vector<12x128xf32>
      %90 = arith.extui %89 : vector<12x128xi1> to vector<12x128xi32>
      %91 = arith.sitofp %90 : vector<12x128xi32> to vector<12x128xf32>
      %92 = arith.truncf %91 : vector<12x128xf32> to vector<12x128xbf16>
      %93 = arith.addf %78, %92 : vector<12x128xbf16>
      %c5_i32 = arith.constant 5 : i32
      %94 = vector.broadcast %c5_i32 : i32 to vector<1x8xi32>
      %95 = arith.cmpi eq, %17, %94 : vector<1x8xi32>
      %cst_17 = arith.constant 0.000000e+00 : f32
      %96 = vector.shape_cast %95 : vector<1x8xi1> to vector<1x8xi1>
      %97 = vector.broadcast %96 : vector<1x8xi1> to vector<12x8xi1>
      %98 = vector.broadcast %cst_17 : f32 to vector<12x8xf32>
      %99 = arith.select %97, %11, %98 : vector<12x8xi1>, vector<12x8xf32>
      %cst_18 = arith.constant dense<0.000000e+00> : vector<12xf32>
      %100 = vector.multi_reduction <add>, %99, %cst_18 [1] : vector<12x8xf32> to vector<12xf32>
      %101 = vector.shape_cast %100 : vector<12xf32> to vector<12x1xf32>
      %102 = vector.broadcast %101 : vector<12x1xf32> to vector<12x128xf32>
      %103 = vector.broadcast %16 : vector<1x128xf32> to vector<12x128xf32>
      %104 = arith.cmpf oeq, %102, %103 : vector<12x128xf32>
      %105 = arith.extui %104 : vector<12x128xi1> to vector<12x128xi32>
      %106 = arith.sitofp %105 : vector<12x128xi32> to vector<12x128xf32>
      %107 = arith.truncf %106 : vector<12x128xf32> to vector<12x128xbf16>
      %108 = arith.addf %93, %107 : vector<12x128xbf16>
      %c6_i32 = arith.constant 6 : i32
      %109 = vector.broadcast %c6_i32 : i32 to vector<1x8xi32>
      %110 = arith.cmpi eq, %17, %109 : vector<1x8xi32>
      %cst_19 = arith.constant 0.000000e+00 : f32
      %111 = vector.shape_cast %110 : vector<1x8xi1> to vector<1x8xi1>
      %112 = vector.broadcast %111 : vector<1x8xi1> to vector<12x8xi1>
      %113 = vector.broadcast %cst_19 : f32 to vector<12x8xf32>
      %114 = arith.select %112, %11, %113 : vector<12x8xi1>, vector<12x8xf32>
      %cst_20 = arith.constant dense<0.000000e+00> : vector<12xf32>
      %115 = vector.multi_reduction <add>, %114, %cst_20 [1] : vector<12x8xf32> to vector<12xf32>
      %116 = vector.shape_cast %115 : vector<12xf32> to vector<12x1xf32>
      %117 = vector.broadcast %116 : vector<12x1xf32> to vector<12x128xf32>
      %118 = vector.broadcast %16 : vector<1x128xf32> to vector<12x128xf32>
      %119 = arith.cmpf oeq, %117, %118 : vector<12x128xf32>
      %120 = arith.extui %119 : vector<12x128xi1> to vector<12x128xi32>
      %121 = arith.sitofp %120 : vector<12x128xi32> to vector<12x128xf32>
      %122 = arith.truncf %121 : vector<12x128xf32> to vector<12x128xbf16>
      %123 = arith.addf %108, %122 : vector<12x128xbf16>
      %c7_i32 = arith.constant 7 : i32
      %124 = vector.broadcast %c7_i32 : i32 to vector<1x8xi32>
      %125 = arith.cmpi eq, %17, %124 : vector<1x8xi32>
      %cst_21 = arith.constant 0.000000e+00 : f32
      %126 = vector.shape_cast %125 : vector<1x8xi1> to vector<1x8xi1>
      %127 = vector.broadcast %126 : vector<1x8xi1> to vector<12x8xi1>
      %128 = vector.broadcast %cst_21 : f32 to vector<12x8xf32>
      %129 = arith.select %127, %11, %128 : vector<12x8xi1>, vector<12x8xf32>
      %cst_22 = arith.constant dense<0.000000e+00> : vector<12xf32>
      %130 = vector.multi_reduction <add>, %129, %cst_22 [1] : vector<12x8xf32> to vector<12xf32>
      %131 = vector.shape_cast %130 : vector<12xf32> to vector<12x1xf32>
      %132 = vector.broadcast %131 : vector<12x1xf32> to vector<12x128xf32>
      %133 = vector.broadcast %16 : vector<1x128xf32> to vector<12x128xf32>
      %134 = arith.cmpf oeq, %132, %133 : vector<12x128xf32>
      %135 = arith.extui %134 : vector<12x128xi1> to vector<12x128xi32>
      %136 = arith.sitofp %135 : vector<12x128xi32> to vector<12x128xf32>
      %137 = arith.truncf %136 : vector<12x128xf32> to vector<12x128xbf16>
      %138 = arith.addf %123, %137 : vector<12x128xbf16>
      %c8_i32 = arith.constant 8 : i32
      %c0_23 = arith.constant 0 : index
      %c0_24 = arith.constant 0 : index
      %139 = vector.load %arg13[%c0_23, %c0_24] : memref<12x32xf32, #tpu.memory_space<vmem>>, vector<12x32xf32>
      %c0_25 = arith.constant 0 : index
      %c0_26 = arith.constant 0 : index
      %140 = vector.load %arg5[%c0_25, %c0_26] : memref<128x32xbf16, #tpu.memory_space<vmem>>, vector<128x32xbf16>
      %cst_27 = arith.constant dense<0.000000e+00> : vector<12x32xf32>
      %141 = tpu.matmul %138, %140, %cst_27 {dimension_numbers = #tpu.dot_dimension_numbers<[1], [0], [0], [1], [0, 0, 1, 1], [], []>} : vector<12x128xbf16>, vector<128x32xbf16>, vector<12x32xf32> -> vector<12x32xf32>
      %142 = arith.addf %139, %141 : vector<12x32xf32>
      %c0_28 = arith.constant 0 : index
      %c0_29 = arith.constant 0 : index
      %143 = vector.load %arg13[%c0_28, %c0_29] : memref<12x32xf32, #tpu.memory_space<vmem>>, vector<12x32xf32>
      tpu.vector_store %arg13[%c0_28, %c0_29], %142 {strides = array<i32>} : memref<12x32xf32, #tpu.memory_space<vmem>>, vector<12x32xf32>,
    } else {
    }
    %c2_i32 = arith.constant 2 : i32
    %8 = arith.cmpi eq, %arg0, %c2_i32 : i32
    %9 = arith.extui %8 : i1 to i32
    %c0_i32_3 = arith.constant 0 : i32
    %10 = arith.cmpi ne, %9, %c0_i32_3 : i32
    scf.if %10 {
      %c0 = arith.constant 0 : index
      %c0_4 = arith.constant 0 : index
      %11 = vector.load %arg4[%c0, %c0_4] : memref<12x1xf32, #tpu.memory_space<vmem>>, vector<12x1xf32>
      %12 = tpu.reciprocal %11 : vector<12x1xf32> -> vector<12x1xf32>
      %c0_5 = arith.constant 0 : index
      %c0_6 = arith.constant 0 : index
      %13 = vector.load %arg13[%c0_5, %c0_6] : memref<12x32xf32, #tpu.memory_space<vmem>>, vector<12x32xf32>
      %14 = vector.broadcast %12 : vector<12x1xf32> to vector<12x32xf32>
      %15 = arith.mulf %13, %14 : vector<12x32xf32>
      %16 = vector.extract_strided_slice %15 {offsets = [0, 0], sizes = [4, 32], strides = [1, 1]} : vector<12x32xf32> to vector<4x32xf32>
      %17 = vector.extract_strided_slice %15 {offsets = [4, 0], sizes = [4, 32], strides = [1, 1]} : vector<12x32xf32> to vector<4x32xf32>
      %18 = arith.addf %16, %17 : vector<4x32xf32>
      %19 = vector.extract_strided_slice %15 {offsets = [8, 0], sizes = [4, 32], strides = [1, 1]} : vector<12x32xf32> to vector<4x32xf32>
      %c0_7 = arith.constant 0 : index
      %c0_8 = arith.constant 0 : index
      %20 = vector.load %arg6[%c0_7, %c0_8] : memref<64x32xf32, #tpu.memory_space<vmem>>, vector<64x32xf32>
      %c0_9 = arith.constant 0 : index
      %c0_10 = arith.constant 0 : index
      %21 = vector.load %arg7[%c0_9, %c0_10] : memref<1x32xf32, #tpu.memory_space<vmem>>, vector<1x32xf32>
      %22 = vector.extract_strided_slice %20 {offsets = [0, 0], sizes = [32, 32], strides = [1, 1]} : vector<64x32xf32> to vector<32x32xf32>
      %cst = arith.constant dense<0.000000e+00> : vector<4x32xf32>
      %23 = tpu.matmul %18, %22, %cst {dimension_numbers = #tpu.dot_dimension_numbers<[1], [0], [0], [1], [0, 0, 1, 1], [], []>} : vector<4x32xf32>, vector<32x32xf32>, vector<4x32xf32> -> vector<4x32xf32>
      %24 = vector.extract_strided_slice %20 {offsets = [32, 0], sizes = [32, 32], strides = [1, 1]} : vector<64x32xf32> to vector<32x32xf32>
      %cst_11 = arith.constant dense<0.000000e+00> : vector<4x32xf32>
      %25 = tpu.matmul %19, %24, %cst_11 {dimension_numbers = #tpu.dot_dimension_numbers<[1], [0], [0], [1], [0, 0, 1, 1], [], []>} : vector<4x32xf32>, vector<32x32xf32>, vector<4x32xf32> -> vector<4x32xf32>
      %26 = arith.addf %23, %25 : vector<4x32xf32>
      %27 = vector.broadcast %21 : vector<1x32xf32> to vector<4x32xf32>
      %28 = arith.addf %26, %27 : vector<4x32xf32>
      %29 = arith.negf %28 : vector<4x32xf32>
      %30 = math.exp %29 : vector<4x32xf32>
      %cst_12 = arith.constant 1.000000e+00 : f32
      %31 = vector.broadcast %cst_12 : f32 to vector<4x32xf32>
      %32 = arith.addf %31, %30 : vector<4x32xf32>
      %33 = arith.divf %31, %32 : vector<4x32xf32>
      %34 = arith.mulf %33, %18 : vector<4x32xf32>
      %35 = arith.addf %18, %34 : vector<4x32xf32>
      %cst_13 = arith.constant 1.000000e+00 : f32
      %36 = vector.broadcast %cst_13 : f32 to vector<4x32xf32>
      %37 = arith.subf %36, %33 : vector<4x32xf32>
      %38 = arith.mulf %37, %19 : vector<4x32xf32>
      %39 = arith.addf %35, %38 : vector<4x32xf32>
      %40 = vector.extract_strided_slice %39 {offsets = [0, 0], sizes = [2, 32], strides = [1, 1]} : vector<4x32xf32> to vector<2x32xf32>
      %41 = vector.extract_strided_slice %39 {offsets = [2, 0], sizes = [2, 32], strides = [1, 1]} : vector<4x32xf32> to vector<2x32xf32>
      %c0_14 = arith.constant 0 : index
      %c0_15 = arith.constant 0 : index
      %42 = vector.load %arg8[%c0_14, %c0_15] : memref<2x64xf32, #tpu.memory_space<vmem>>, vector<2x64xf32>
      %c0_16 = arith.constant 0 : index
      %c0_17 = arith.constant 0 : index
      %43 = vector.load %arg9[%c0_16, %c0_17] : memref<2x1xf32, #tpu.memory_space<vmem>>, vector<2x1xf32>
      %44 = vector.extract_strided_slice %42 {offsets = [0, 0], sizes = [2, 32], strides = [1, 1]} : vector<2x64xf32> to vector<2x32xf32>
      %cst_18 = arith.constant dense<0.000000e+00> : vector<2x2xf32>
      %45 = tpu.matmul %44, %40, %cst_18 {dimension_numbers = #tpu.dot_dimension_numbers<[1], [1], [0], [0], [0, 0, 1, 0], [], []>} : vector<2x32xf32>, vector<2x32xf32>, vector<2x2xf32> -> vector<2x2xf32>
      %46 = vector.extract_strided_slice %42 {offsets = [0, 32], sizes = [2, 32], strides = [1, 1]} : vector<2x64xf32> to vector<2x32xf32>
      %cst_19 = arith.constant dense<0.000000e+00> : vector<2x2xf32>
      %47 = tpu.matmul %46, %41, %cst_19 {dimension_numbers = #tpu.dot_dimension_numbers<[1], [1], [0], [0], [0, 0, 1, 0], [], []>} : vector<2x32xf32>, vector<2x32xf32>, vector<2x2xf32> -> vector<2x2xf32>
      %48 = arith.addf %45, %47 : vector<2x2xf32>
      %49 = vector.broadcast %43 : vector<2x1xf32> to vector<2x2xf32>
      %50 = arith.addf %48, %49 : vector<2x2xf32>
      %51 = vector.extract_strided_slice %50 {offsets = [0, 0], sizes = [1, 2], strides = [1, 1]} : vector<2x2xf32> to vector<1x2xf32>
      %52 = vector.extract_strided_slice %50 {offsets = [1, 0], sizes = [1, 2], strides = [1, 1]} : vector<2x2xf32> to vector<1x2xf32>
      %c0_20 = arith.constant 0 : index
      %c0_21 = arith.constant 0 : index
      %53 = vector.load %arg10[%c0_20, %c0_21] : memref<1x2xi32, #tpu.memory_space<vmem>>, vector<1x2xi32>
      %54 = arith.maximumf %51, %52 : vector<1x2xf32>
      %55 = arith.subf %51, %54 : vector<1x2xf32>
      %56 = math.exp %55 : vector<1x2xf32>
      %57 = arith.subf %52, %54 : vector<1x2xf32>
      %58 = math.exp %57 : vector<1x2xf32>
      %59 = arith.addf %56, %58 : vector<1x2xf32>
      %60 = math.log %59 : vector<1x2xf32>
      %61 = arith.addf %54, %60 : vector<1x2xf32>
      %c1_i32 = arith.constant 1 : i32
      %62 = vector.broadcast %c1_i32 : i32 to vector<1x2xi32>
      %63 = arith.cmpi eq, %53, %62 : vector<1x2xi32>
      %64 = arith.select %63, %52, %51 : vector<1x2xi1>, vector<1x2xf32>
      %65 = arith.subf %61, %64 : vector<1x2xf32>
      %cst_22 = arith.constant dense<0.000000e+00> : vector<1xf32>
      %66 = vector.multi_reduction <add>, %65, %cst_22 [1] : vector<1x2xf32> to vector<1xf32>
      %67 = vector.shape_cast %66 : vector<1xf32> to vector<1x1xf32>
      %cst_23 = arith.constant 2.000000e+00 : f32
      %68 = vector.broadcast %cst_23 : f32 to vector<1x1xf32>
      %69 = arith.divf %67, %68 : vector<1x1xf32>
      %c0_24 = arith.constant 0 : index
      %c0_25 = arith.constant 0 : index
      %70 = vector.load %arg11[%c0_24, %c0_25] : memref<1x1xf32, #tpu.memory_space<vmem>>, vector<1x1xf32>
      tpu.vector_store %arg11[%c0_24, %c0_25], %69 {strides = array<i32>} : memref<1x1xf32, #tpu.memory_space<vmem>>, vector<1x1xf32>,
      %71 = arith.cmpf ogt, %52, %51 : vector<1x2xf32>
      %72 = arith.extui %71 : vector<1x2xi1> to vector<1x2xi32>
      %c0_26 = arith.constant 0 : index
      %c0_27 = arith.constant 0 : index
      %73 = vector.load %arg12[%c0_26, %c0_27] : memref<1x2xi32, #tpu.memory_space<vmem>>, vector<1x2xi32>
      tpu.vector_store %arg12[%c0_26, %c0_27], %72 {strides = array<i32>} : memref<1x2xi32, #tpu.memory_space<vmem>>, vector<1x2xi32>,
    } else {
    }
    return
  }
  func.func @transform_0(%arg0: i32, %arg1: memref<3xi32, #tpu.memory_space<smem>>, %arg2: memref<3xi32, #tpu.memory_space<smem>>) -> (i32, i32) {
    %c0_i32 = arith.constant 0 : i32
    %c0_i32_0 = arith.constant 0 : i32
    %c0_i32_1 = arith.constant 0 : i32
    return %c0_i32, %c0_i32_0 : i32, i32
  }
  func.func @transform_1(%arg0: i32, %arg1: memref<3xi32, #tpu.memory_space<smem>>, %arg2: memref<3xi32, #tpu.memory_space<smem>>) -> (i32, i32) {
    %c0_i32 = arith.constant 0 : i32
    %c0_i32_0 = arith.constant 0 : i32
    %c0_i32_1 = arith.constant 0 : i32
    return %c0_i32, %c0_i32_0 : i32, i32
  }
  func.func @transform_2(%arg0: i32, %arg1: memref<3xi32, #tpu.memory_space<smem>>, %arg2: memref<3xi32, #tpu.memory_space<smem>>) -> (i32, i32) {
    %0 = arith.index_cast %arg0 : i32 to index
    %1 = memref.load %arg2[%0] : memref<3xi32, #tpu.memory_space<smem>>
    %c0_i32 = arith.constant 0 : i32
    %c0_i32_0 = arith.constant 0 : i32
    return %1, %c0_i32 : i32, i32
  }
  func.func @transform_3(%arg0: i32, %arg1: memref<3xi32, #tpu.memory_space<smem>>, %arg2: memref<3xi32, #tpu.memory_space<smem>>) -> (i32, i32) {
    %c0_i32 = arith.constant 0 : i32
    %c0_i32_0 = arith.constant 0 : i32
    %c0_i32_1 = arith.constant 0 : i32
    return %c0_i32, %c0_i32_0 : i32, i32
  }
  func.func @transform_4(%arg0: i32, %arg1: memref<3xi32, #tpu.memory_space<smem>>, %arg2: memref<3xi32, #tpu.memory_space<smem>>) -> (i32, i32) {
    %c0_i32 = arith.constant 0 : i32
    %c0_i32_0 = arith.constant 0 : i32
    %c0_i32_1 = arith.constant 0 : i32
    return %c0_i32, %c0_i32_0 : i32, i32
  }
  func.func @transform_5(%arg0: i32, %arg1: memref<3xi32, #tpu.memory_space<smem>>, %arg2: memref<3xi32, #tpu.memory_space<smem>>) -> (i32, i32) {
    %c0_i32 = arith.constant 0 : i32
    %c0_i32_0 = arith.constant 0 : i32
    %c0_i32_1 = arith.constant 0 : i32
    return %c0_i32, %c0_i32_0 : i32, i32
  }
  func.func @transform_6(%arg0: i32, %arg1: memref<3xi32, #tpu.memory_space<smem>>, %arg2: memref<3xi32, #tpu.memory_space<smem>>) -> (i32, i32) {
    %c0_i32 = arith.constant 0 : i32
    %c0_i32_0 = arith.constant 0 : i32
    %c0_i32_1 = arith.constant 0 : i32
    return %c0_i32, %c0_i32_0 : i32, i32
  }
  func.func @transform_7(%arg0: i32, %arg1: memref<3xi32, #tpu.memory_space<smem>>, %arg2: memref<3xi32, #tpu.memory_space<smem>>) -> (i32, i32) {
    %c0_i32 = arith.constant 0 : i32
    %c0_i32_0 = arith.constant 0 : i32
    %c0_i32_1 = arith.constant 0 : i32
    return %c0_i32, %c0_i32_0 : i32, i32
  }
  func.func @transform_8(%arg0: i32, %arg1: memref<3xi32, #tpu.memory_space<smem>>, %arg2: memref<3xi32, #tpu.memory_space<smem>>) -> (i32, i32) {
    %c0_i32 = arith.constant 0 : i32
    %c0_i32_0 = arith.constant 0 : i32
    %c0_i32_1 = arith.constant 0 : i32
    return %c0_i32, %c0_i32_0 : i32, i32
  }
  func.func @transform_9(%arg0: i32, %arg1: memref<3xi32, #tpu.memory_space<smem>>, %arg2: memref<3xi32, #tpu.memory_space<smem>>) -> (i32, i32) {
    %c0_i32 = arith.constant 0 : i32
    %c0_i32_0 = arith.constant 0 : i32
    %c0_i32_1 = arith.constant 0 : i32
    return %c0_i32, %c0_i32_0 : i32, i32
  }
}

</mosaic_0001>

<bundles_post_ra>
// kernel: tpu_custom_call.1
= control target key start
LH: loop header
LB: loop body
LE: loop exit
PB: predicated region body
PF: predicated region fallthrough
CT: control target
= control target key end

     0   :  { %s1206_s23 = smov [#allocation4]   ;;  %s1207_s24 = smov [#allocation5]   ;;  %s1449_s0 = inlined_call_operand.vmem [shape: s32[3], index: 0, kind: input, shape index: {}]   ;;  %s1450_s2 = inlined_call_operand.vmem [shape: f32[12,8], index: 2, kind: input, shape index: {}]   ;;  %s1451_s3 = inlined_call_operand.vmem [shape: f32[12,1], index: 3, kind: input, shape index: {}]   ;;  %s1452_s4 = inlined_call_operand.vmem [shape: bf16[384,32], index: 4, kind: input, shape index: {}]   ;;  %s1453_s5 = inlined_call_operand.vmem [shape: f32[64,32], index: 5, kind: input, shape index: {}]   ;;  %s1454_s6 = inlined_call_operand.vmem [shape: f32[1,32], index: 6, kind: input, shape index: {}]   ;;  %s1455_s7 = inlined_call_operand.vmem [shape: f32[2,64], index: 7, kind: input, shape index: {}]   ;;  %s1456_s8 = inlined_call_operand.vmem [shape: f32[2,1], index: 8, kind: input, shape index: {}]   ;;  %s1457_s9 = inlined_call_operand.vmem [shape: s32[1,2], index: 9, kind: input, shape index: {}]   ;;  %s1458_s10 = inlined_call_operand.hbm [shape: f32[1,1], index: 10, kind: output, shape index: {0}]   ;;  %s1459_s11 = inlined_call_operand.hbm [shape: s32[1,2], index: 11, kind: output, shape index: {1}]   ;;  %s1460_s1 = inlined_call_operand.vmem [shape: s32[3], index: 1, kind: input, shape index: {}]  }
   0x1   :  { %s18_s19 = sshll.u32 %s1449_s0, 4  ;;  %s23_s22 = sshll.u32 %s1460_s1, 4  ;;  %s19_s19 = int_to_ptr.vmem [resolvable:$true] %s18_s19  ;;  %s24_s22 = int_to_ptr.vmem [resolvable:$true] %s23_s22 }
   0x2   :  { %21 = dma.vmem_to_smem %s19_s19, 16, %s1206_s23, [#allocation3] }
   0x3   :  { %26 = dma.vmem_to_smem %s24_s22, 16, %s1207_s24, [#allocation3] }
   0x4   :  { %1192 = dma.done.wait [#allocation3], 32 }
   0x5   :  { %1193 = vsyncadd [#allocation3], 4294967264 }
   0x6   :  { %29 = sfence }
   0x7   :  { %30 = vsyncpa [#allocation7], 0 }
   0x8   :  { %31 = vsyncpa [#allocation9], 0  ;;  %s1281_s25 = smov 0  }
   0x9 LB: > { %s1287_s0 = sadd.s32 4294967295, %s1204_s25   ;;  %p984_p0 = scmp.ge.s32.totalorder %s1204_s25, 1  ;;  %s1204_s25 = sphi %s1281_s25, %s37_s25  }
   0xa   : > { %p302_p1 = scmp.lt.s32.totalorder %s1204_s25, 4 }
   0xc   : > { %p303_p2 = pnand %p984_p0, %p302_p1 }
   0xd   : > { %s334_s1 = sld [smem:[#allocation5 + %s1287_s0]] (!%p303_p2)  ;;  %p987_p4 = scmp.ne.s32.totalorder (!%p303_p2), %s1287_s0, 0 }
   0xe   : > { %306 = sbr.rel (%p303_p2) target bundleno = 970 (0x3ca), region = 52 }
  0x13   : > { %s985_s26 = sshll.u32 %s334_s1, 4 }
  0x14   : > { %p336_p3 = scmp.lt.s32.totalorder %s985_s26, 47  ;;  %345 = sbr.rel (%p987_p4) target bundleno = 28 (0x1c), region = 56 }
  0x16   : > { %s1462_s26 = smov (!%p336_p3, %s985_s26), 47 }
  0x17   : > { %s986_s27 = sshll.u32 %s1462_s26, 2 }
  0x18   : > { %s1295_s30 = scalar_lea.vmem %s1452_s4, %s986_s27 }
  0x19   : > { %vm346_vm0 = vcmask 261120   ;;  %vm348_vm1 = vcmask 257024   ;;  %v1208_v0 = vmov 0.0  }
  0x1a   : > { %347 = vst.msk [vmem:[#allocation2] sm:$0xff] %vm346_vm0, %v1208_v0 }
  0x1b   : > { %349 = vst.msk [vmem:[#allocation2 + $0x8] sm:$0xf] %vm348_vm1, %v1208_v0 }
  0x1c PF: > { %s350_s12 = sld [smem:[#allocation4 + %s1287_s0]] }
  0x22   : > { %p988_p5 = scmp.eq.s32.totalorder %s350_s12, 0 }
  0x23   : > { %s989_s17 = sshll.u32 (!%p988_p5), %s1287_s0, 7 }
  0x24   : > { %354 = sbr.rel (%p988_p5) target bundleno = 351 (0x15f), region = 60 }
  0x29   : > { %v357_v1 = vlaneseq  ;;  %v355_v2 = vld [vmem:[%s1450_s2] sm:$0xff]  ;;  %vm368_vm2 = vcmask 64512   ;;  %v356_v10 = vld [vmem:[%s1450_s2 + $0x8] sm:$0xf]  ;;  %vm372_vm6 = vcmask 60416   ;;  %v1059_v37 = vld [vmem:[%s1295_s30 + $0x38] sm:$0xff]  ;;  %v360_v38 = vstv %s989_s17 }
  0x2a   : > { %644 = vmatpush.bf16.msra.mxu0 %v1059_v37  ;;  %v1058_v39 = vld [vmem:[%s1295_s30 + $0x30] sm:$0xff]  ;;  %v1057_v41 = vld [vmem:[%s1295_s30 + $0x28] sm:$0xff]  ;;  %v1056_v43 = vld [vmem:[%s1295_s30 + $0x20] sm:$0xff]  ;;  %v1209_v47 = vmov 0.0  }
  0x2b   : > { %v1302_v3 = vand.u32 127, %v357_v1  ;;  %v1055_v50 = vld [vmem:[%s1295_s30 + $0x18] sm:$0xff]  ;;  %v1054_v54 = vld [vmem:[%s1295_s30 + $0x10] sm:$0xff]  ;;  %v1053_v62 = vld [vmem:[%s1295_s30 + $0x8] sm:$0xff] }
  0x2d   : > { %vm390_vm3 = vcmp.eq.s32.totalorder %v1302_v3, 1  ;;  %vm363_vm4 = vcmp.eq.s32.totalorder %v1302_v3, 0  ;;  %vm417_vm5 = vcmp.eq.s32.totalorder %v1302_v3, 2  ;;  %vm444_vm7 = vcmp.eq.s32.totalorder %v1302_v3, 3 }
  0x2e   : > { %v393_v4 = vsel %vm390_vm3, %v355_v2, 0.0  ;;  %v366_v5 = vsel %vm363_vm4, %v355_v2, 0.0  ;;  %v420_v6 = vsel %vm417_vm5, %v355_v2, 0.0  ;;  %v394_v11 = vsel %vm390_vm3, %v356_v10, 0.0  ;;  %645 = vmatpush.bf16.msra.mxu0 %v1058_v39 }
  0x2f   : > { %v395_v7 = vsel %vm368_vm2, %v393_v4, 0.0  ;;  %v369_v8 = vsel %vm368_vm2, %v366_v5, 0.0  ;;  %v422_v9 = vsel %vm368_vm2, %v420_v6, 0.0  ;;  %v367_v12 = vsel %vm363_vm4, %v356_v10, 0.0 }
  0x30   : > { %396 = vadd.xlane.f32.xlu1 %v395_v7  ;;  %370 = vadd.xlane.f32.xlu0 %v369_v8  ;;  %v421_v13 = vsel %vm417_vm5, %v356_v10, 0.0  ;;  %v398_v14 = vsel %vm372_vm6, %v394_v11, 0.0  ;;  %v373_v15 = vsel %vm372_vm6, %v367_v12, 0.0  ;;  %vm471_vm8 = vcmp.eq.s32.totalorder %v1302_v3, 4 }
  0x31   : > { %423 = vadd.xlane.f32.xlu2 %v422_v9  ;;  %v425_v16 = vsel %vm372_vm6, %v421_v13, 0.0  ;;  %v447_v17 = vsel %vm444_vm7, %v355_v2, 0.0  ;;  %v448_v18 = vsel %vm444_vm7, %v356_v10, 0.0  ;;  %v474_v19 = vsel %vm471_vm8, %v355_v2, 0.0 }
  0x32   : > { %v449_v20 = vsel %vm368_vm2, %v447_v17, 0.0  ;;  %v452_v21 = vsel %vm372_vm6, %v448_v18, 0.0  ;;  %v476_v22 = vsel %vm368_vm2, %v474_v19, 0.0  ;;  %vm498_vm9 = vcmp.eq.s32.totalorder %v1302_v3, 5  ;;  %646 = vmatpush.bf16.msra.mxu0 %v1057_v41 }
  0x33   : > { %v475_v23 = vsel %vm471_vm8, %v356_v10, 0.0  ;;  %v501_v24 = vsel %vm498_vm9, %v355_v2, 0.0  ;;  %v502_v25 = vsel %vm498_vm9, %v356_v10, 0.0  ;;  %vm525_vm10 = vcmp.eq.s32.totalorder %v1302_v3, 6 }
  0x34   : > { %v479_v26 = vsel %vm372_vm6, %v475_v23, 0.0  ;;  %v503_v27 = vsel %vm368_vm2, %v501_v24, 0.0  ;;  %v506_v28 = vsel %vm372_vm6, %v502_v25, 0.0  ;;  %vm552_vm11 = vcmp.eq.s32.totalorder %v1302_v3, 7 }
  0x35   : > { %v528_v29 = vsel %vm525_vm10, %v355_v2, 0.0  ;;  %v529_v30 = vsel %vm525_vm10, %v356_v10, 0.0  ;;  %v555_v31 = vsel %vm552_vm11, %v355_v2, 0.0  ;;  %v556_v35 = vsel %vm552_vm11, %v356_v10, 0.0 }
  0x36   : > { %v530_v32 = vsel %vm368_vm2, %v528_v29, 0.0  ;;  %v533_v33 = vsel %vm372_vm6, %v529_v30, 0.0  ;;  %v557_v34 = vsel %vm368_vm2, %v555_v31, 0.0  ;;  %v560_v36 = vsel %vm372_vm6, %v556_v35, 0.0  ;;  %647 = vmatpush.bf16.msra.mxu0 %v1056_v43 }
  0x37   : > { %v361_v40 = vadd.s32 %v360_v38, %v1302_v3  ;;  %v1052_v3 = vld [vmem:[%s1295_s30] sm:$0xff] }
  0x38   : > { %399 = vadd.xlane.f32.xlu1 %v398_v14  ;;  %374 = vadd.xlane.f32.xlu0 %v373_v15 }
  0x39   : > { %426 = vadd.xlane.f32.xlu2 %v425_v16  ;;  %v1336_v42 = vcvt.s32.f32 %v361_v40 }
  0x3a   : > { %648 = vmatpush.bf16.msra.mxu0 %v1055_v50 }
  0x3e   : > { %649 = vmatpush.bf16.msra.mxu0 %v1054_v54 }
  0x40   : > { %450 = vadd.xlane.f32.xlu0 %v449_v20  ;;  %453 = vadd.xlane.f32.xlu1 %v452_v21 }
  0x41   : > { %477 = vadd.xlane.f32.xlu2 %v476_v22 }
  0x42   : > { %650 = vmatpush.bf16.msra.mxu0 %v1053_v62 }
  0x46   : > { %651 = vmatpush.bf16.msra.mxu0 %v1052_v3 }
  0x48   : > { %480 = vadd.xlane.f32.xlu0 %v479_v26  ;;  %504 = vadd.xlane.f32.xlu1 %v503_v27 }
  0x49   : > { %507 = vadd.xlane.f32.xlu2 %v506_v28 }
  0x50   : > { %531 = vadd.xlane.f32.xlu0 %v530_v32  ;;  %534 = vadd.xlane.f32.xlu1 %v533_v33 }
  0x51   : > { %558 = vadd.xlane.f32.xlu2 %v557_v34 }
  0x58   : > { %561 = vadd.xlane.f32.xlu0 %v560_v36 }
  0xa3   : > { %v397_v44 = vpop.xlane.xlu1 %396  ;;  %v371_v45 = vpop.xlane.xlu0 %370 }
  0xa4   : > { %vm401_vm12 = vcmp.eq.f32.partialorder %v397_v44, %v1336_v42  ;;  %vm376_vm13 = vcmp.eq.f32.partialorder %v371_v45, %v1336_v42  ;;  %v424_v46 = vpop.xlane.xlu2 %423 }
  0xa5   : > { %v992_v48 = vsel %vm401_vm12, 1.0, %v1209_v47  ;;  %v990_v49 = vsel %vm376_vm13, 1.0, %v1209_v47  ;;  %vm428_vm14 = vcmp.eq.f32.partialorder %v424_v46, %v1336_v42  ;;  %vm660_vm12 = vcmask 261120  }
  0xa6   : > { %v413_v51 = vadd.f32 %v992_v48, %v990_v49  ;;  %v994_v53 = vsel %vm428_vm14, 1.0, %v1209_v47  ;;  %vm662_vm13 = vcmask 257024  }
  0xa8   : > { %v415_v52 = vpack.c.bf16 %v413_v51, %v413_v51 }
  0xaa   : > { %v436_v55 = vunpack.c.l.bf16 %v415_v52 }
  0xab   : > { %v400_v56 = vpop.xlane.xlu1 %399  ;;  %v375_v57 = vpop.xlane.xlu0 %374 }
  0xac   : > { %v440_v58 = vadd.f32 %v994_v53, %v436_v55  ;;  %vm402_vm15 = vcmp.eq.f32.partialorder %v400_v56, %v1336_v42  ;;  %vm377_vm0 = vcmp.eq.f32.partialorder %v375_v57, %v1336_v42  ;;  %v427_v59 = vpop.xlane.xlu2 %426 }
  0xad   : > { %v993_v60 = vsel %vm402_vm15, 1.0, %v1209_v47  ;;  %v991_v61 = vsel %vm377_vm0, 1.0, %v1209_v47  ;;  %vm429_vm1 = vcmp.eq.f32.partialorder %v427_v59, %v1336_v42 }
  0xae   : > { %v414_v63 = vadd.f32 %v993_v60, %v991_v61  ;;  %v442_v0 = vpack.c.bf16 %v440_v58, %v440_v58  ;;  %v995_v2 = vsel %vm429_vm1, 1.0, %v1209_v47  ;;  %v578_v58 = vld [vmem:[#allocation2] sm:$0xff]  ;;  %v579_v61 = vld [vmem:[#allocation2 + $0x8] sm:$0xf] }
  0xb0   : > { %v416_v1 = vpack.c.bf16 %v414_v63, %v414_v63  ;;  %v463_v7 = vunpack.c.l.bf16 %v442_v0 }
  0xb2   : > { %v437_v4 = vunpack.c.l.bf16 %v416_v1 }
  0xb3   : > { %v451_v5 = vpop.xlane.xlu0 %450  ;;  %v454_v6 = vpop.xlane.xlu1 %453 }
  0xb4   : > { %v441_v8 = vadd.f32 %v995_v2, %v437_v4  ;;  %vm455_vm2 = vcmp.eq.f32.partialorder %v451_v5, %v1336_v42  ;;  %vm456_vm3 = vcmp.eq.f32.partialorder %v454_v6, %v1336_v42  ;;  %v478_v9 = vpop.xlane.xlu2 %477 }
  0xb5   : > { %v996_v10 = vsel %vm455_vm2, 1.0, %v1209_v47  ;;  %vm482_vm4 = vcmp.eq.f32.partialorder %v478_v9, %v1336_v42  ;;  %v997_v13 = vsel %vm456_vm3, 1.0, %v1209_v47 }
  0xb6   : > { %v443_v11 = vpack.c.bf16 %v441_v8, %v441_v8  ;;  %v467_v12 = vadd.f32 %v996_v10, %v463_v7  ;;  %v998_v16 = vsel %vm482_vm4, 1.0, %v1209_v47 }
  0xb8   : > { %v464_v14 = vunpack.c.l.bf16 %v443_v11  ;;  %v469_v15 = vpack.c.bf16 %v467_v12, %v467_v12 }
  0xba   : > { %v490_v17 = vunpack.c.l.bf16 %v469_v15  ;;  %v468_v18 = vadd.f32 %v997_v13, %v464_v14 }
  0xbb   : > { %v481_v19 = vpop.xlane.xlu0 %480  ;;  %v505_v20 = vpop.xlane.xlu1 %504 }
  0xbc   : > { %v470_v21 = vpack.c.bf16 %v468_v18, %v468_v18  ;;  %v494_v22 = vadd.f32 %v998_v16, %v490_v17  ;;  %vm483_vm5 = vcmp.eq.f32.partialorder %v481_v19, %v1336_v42  ;;  %vm509_vm6 = vcmp.eq.f32.partialorder %v505_v20, %v1336_v42  ;;  %v508_v24 = vpop.xlane.xlu2 %507 }
  0xbd   : > { %v999_v23 = vsel %vm483_vm5, 1.0, %v1209_v47  ;;  %v1000_v27 = vsel %vm509_vm6, 1.0, %v1209_v47  ;;  %vm510_vm7 = vcmp.eq.f32.partialorder %v508_v24, %v1336_v42 }
  0xbe   : > { %v491_v25 = vunpack.c.l.bf16 %v470_v21  ;;  %v496_v26 = vpack.c.bf16 %v494_v22, %v494_v22  ;;  %v1001_v32 = vsel %vm510_vm7, 1.0, %v1209_v47 }
  0xc0   : > { %v517_v28 = vunpack.c.l.bf16 %v496_v26  ;;  %v495_v29 = vadd.f32 %v999_v23, %v491_v25 }
  0xc2   : > { %v497_v30 = vpack.c.bf16 %v495_v29, %v495_v29  ;;  %v521_v31 = vadd.f32 %v1000_v27, %v517_v28 }
  0xc3   : > { %v532_v33 = vpop.xlane.xlu0 %531  ;;  %v535_v34 = vpop.xlane.xlu1 %534 }
  0xc4   : > { %v518_v35 = vunpack.c.l.bf16 %v497_v30  ;;  %v523_v36 = vpack.c.bf16 %v521_v31, %v521_v31  ;;  %vm536_vm8 = vcmp.eq.f32.partialorder %v532_v33, %v1336_v42  ;;  %vm537_vm9 = vcmp.eq.f32.partialorder %v535_v34, %v1336_v42  ;;  %v559_v44 = vpop.xlane.xlu2 %558 }
  0xc5   : > { %v1002_v37 = vsel %vm536_vm8, 1.0, %v1209_v47  ;;  %v1003_v43 = vsel %vm537_vm9, 1.0, %v1209_v47  ;;  %vm563_vm10 = vcmp.eq.f32.partialorder %v559_v44, %v1336_v42 }
  0xc6   : > { %v544_v38 = vunpack.c.l.bf16 %v523_v36  ;;  %v522_v39 = vadd.f32 %v1001_v32, %v518_v35  ;;  %v1004_v52 = vsel %vm563_vm10, 1.0, %v1209_v47 }
  0xc8   : > { %v524_v40 = vpack.c.bf16 %v522_v39, %v522_v39  ;;  %v548_v41 = vadd.f32 %v1002_v37, %v544_v38 }
  0xca   : > { %v545_v45 = vunpack.c.l.bf16 %v524_v40  ;;  %v550_v46 = vpack.c.bf16 %v548_v41, %v548_v41 }
  0xcb   : > { %v562_v48 = vpop.xlane.xlu0 %561 }
  0xcc   : > { %v549_v49 = vadd.f32 %v1003_v43, %v545_v45  ;;  %vm564_vm11 = vcmp.eq.f32.partialorder %v562_v48, %v1336_v42  ;;  %v571_v50 = vunpack.c.l.bf16 %v550_v46 }
  0xcd   : > { %v1005_v53 = vsel %vm564_vm11, 1.0, %v1209_v47 }
  0xce   : > { %v551_v51 = vpack.c.bf16 %v549_v49, %v549_v49  ;;  %v575_v55 = vadd.f32 %v1004_v52, %v571_v50 }
  0xd0   : > { %v572_v54 = vunpack.c.l.bf16 %v551_v51 }
  0xd2   : > { %v576_v56 = vadd.f32 %v1005_v53, %v572_v54 }
  0xd4   : > { %v577_v57 = vpack.c.bf16 %v576_v56, %v575_v55 }
  0xd6   : > { %652 = vmatmul.bf16.vlgmr.msra.gmra.mxu0 %v577_v57 }
 0x153   : > { %v653_v59 = vpop.f32.mrf.mxu0 }
 0x154   : > { %v658_v60 = vadd.f32 %v653_v59, %v578_v58 }
 0x156   : > { %661 = vst.msk [vmem:[#allocation2] sm:$0xff] %vm660_vm12, %v658_v60 }
 0x15b   : > { %v655_v62 = vpop.f32.mrf.mxu0 }
 0x15c   : > { %v659_v42 = vadd.f32 %v655_v62, %v579_v61 }
 0x15e   : > { %663 = vst.msk [vmem:[#allocation2 + $0x8] sm:$0xf] %vm662_vm13, %v659_v42 }
 0x15f PF: > { %p1038_p6 = scmp.ne.s32.totalorder %s1287_s0, 2 }
 0x160   : > { %s1211_s21 = smov (!%p1038_p6), 96  }
 0x161   : > { %667 = sbr.rel (%p1038_p6) target bundleno = 960 (0x3c0), region = 64 }
 0x166   : > { %v668_v47 = vld [vmem:[%s1451_s3] sm:$0xff]  ;;  %v669_v63 = vld [vmem:[%s1451_s3 + $0x8] sm:$0xf]  ;;  %v719_v0 = vld [vmem:[%s1453_s5 + $0x18] sm:$0xff]  ;;  %v1210_v1 = vmov 0   ;;  %vm725_vm6 = vcmask 261120  }
 0x167   : > { %1089 = vset.pattern.permute.xlu0 %v1210_v1  ;;  %1092 = vrcp.f32 %v668_v47  ;;  %764 = vmatpush.msra.mxu1 %v719_v0  ;;  %v681_v5 = vand.u32 2147483648, %v668_v47  ;;  %vm675_vm14 = vweird.f32 %v668_v47  ;;  %v679_v8 = vand.u32 2147483647, %v668_v47  ;;  %v718_v22 = vld [vmem:[%s1453_s5 + $0x10] sm:$0xff]  ;;  %v723_v23 = vld [vmem:[%s1453_s5 + $0x38] sm:$0xff]  ;;  %v717_v24 = vld [vmem:[%s1453_s5 + $0x8] sm:$0xff] }
 0x168   : > { %1094 = vrcp.f32 %v669_v63  ;;  %1090 = vset.pattern.permute.xlu1 %v1210_v1  ;;  %vm689_vm2 = vweird.f32 %v669_v63  ;;  %v695_v14 = vand.u32 2147483648, %v669_v63  ;;  %v693_v17 = vand.u32 2147483647, %v669_v63  ;;  %741 = vmatpush.msra.mxu0 %v723_v23  ;;  %v722_v25 = vld [vmem:[%s1453_s5 + $0x30] sm:$0xff]  ;;  %v716_v26 = vld [vmem:[%s1453_s5] sm:$0xff]  ;;  %v721_v27 = vld [vmem:[%s1453_s5 + $0x28] sm:$0xff] }
 0x169   : > { %v682_v11 = vor.u32 1.1754944e-38, %v681_v5  ;;  %vm680_vm1 = vcmp.eq.f32.partialorder %v679_v8, 8.507059e+37  ;;  %765 = vmatpush.msra.mxu1 %v718_v22  ;;  %v720_v28 = vld [vmem:[%s1453_s5 + $0x20] sm:$0xff]  ;;  %v698_v30 = vld [vmem:[#allocation2] sm:$0xff]  ;;  %v699_v35 = vld [vmem:[#allocation2 + $0x8] sm:$0xf] }
 0x16a   : > { %v696_v19 = vor.u32 1.1754944e-38, %v695_v14  ;;  %vm694_vm5 = vcmp.eq.f32.partialorder %v693_v17, 8.507059e+37  ;;  %742 = vmatpush.msra.mxu0 %v722_v25  ;;  %v800_v29 = vld [vmem:[%s1455_s7] sm:$0x3]  ;;  %vm907_vm11 = vcmask 9217  }
 0x16b   : > { %766 = vmatpush.msra.mxu1 %v717_v24  ;;  %803 = vrot.lane.b32.xlu1 %v800_v29, %s1211_s21  ;;  %v1091_v38 = vld [vmem:[%s1454_s6] ss:$0 sm:$0xff] }
 0x16c   : > { %743 = vmatpush.msra.mxu0 %v721_v27  ;;  %v801_v45 = vld [vmem:[%s1456_s8] sm:$0x3] }
 0x16d   : > { %v1093_v2 = vpop.eup %1092  ;;  %767 = vmatpush.msra.mxu1 %v716_v26  ;;  %v1212_v26 = vmov 2.0  }
 0x16e   : > { %v1095_v3 = vpop.eup %1094  ;;  %v671_v4 = vmul.f32 %v1093_v2, %v668_v47  ;;  %vm676_vm15 = vweird.f32 %v1093_v2  ;;  %744 = vmatpush.msra.mxu0 %v720_v28 }
 0x16f   : > { %v685_v6 = vmul.f32 %v1095_v3, %v669_v63  ;;  %vm677_vm0 = vmor %vm675_vm14, %vm676_vm15  ;;  %vm690_vm3 = vweird.f32 %v1095_v3  ;;  %vm889_vm14 = vcmask 8192  }
 0x170   : > { %v672_v7 = vsub.f32 1.0, %v671_v4  ;;  %vm691_vm4 = vmor %vm689_vm2, %vm690_vm3 }
 0x171   : > { %v686_v9 = vsub.f32 1.0, %v685_v6 }
 0x172   : > { %v673_v10 = vmul.f32 %v1093_v2, %v672_v7 }
 0x173   : > { %v687_v12 = vmul.f32 %v1095_v3, %v686_v9  ;;  %857 = vperm.xlu1 %1090, %v801_v45  }
 0x174   : > { %v674_v13 = vadd.f32 %v1093_v2, %v673_v10 }
 0x175   : > { %v688_v16 = vadd.f32 %v1095_v3, %v687_v12 }
 0x176   : > { %v678_v15 = vsel %vm677_vm0, %v1093_v2, %v674_v13  ;;  %vm901_vm0 = vcmask 0  }
 0x177   : > { %v683_v18 = vsel %vm680_vm1, %v682_v11, %v678_v15  ;;  %v692_v20 = vsel %vm691_vm4, %v1095_v3, %v688_v16 }
 0x178   : > { %702 = vperm.xlu0 %1089, %v683_v18   ;;  %v697_v21 = vsel %vm694_vm5, %v696_v19, %v692_v20  ;;  %v861_v19 = vld [vmem:[%s1457_s9] sm:$0x1] }
 0x179   : > { %vm882_vm13 = vcmp.eq.s32.totalorder %v861_v19, 1 }
 0x180   : > { %707 = vperm.xlu0 %1089, %v697_v21  }
 0x1dd   : > { %v804_v63 = vpop.permute.xlu1 %803 }
 0x1e5   : > { %v858_v3 = vpop.permute.xlu1 %857 }
 0x1ea   : > { %v703_v31 = vpop.permute.xlu0 %702 }
 0x1eb   : > { %v710_v32 = vmul.f32 %v703_v31, %v698_v30 }
 0x1ed   : > { %v713_v33 = vrot.slane %v710_v32, 4 }
 0x1ef   : > { %v715_v34 = vadd.f32 %v713_v33, %v710_v32 }
 0x1f1   : > { %1040 = vmatmul.msk.f32.vlgmr.msra.gmra.mxu1 %vm725_vm6, %v715_v34 }
 0x1f2   : > { %v708_v36 = vpop.permute.xlu0 %707 }
 0x1f3   : > { %v711_v37 = vmul.f32 %v708_v36, %v699_v35 }
 0x1f5   : > { %1039 = vmatmul.msk.f32.vlgmr.msra.gmra.mxu0 %vm725_vm6, %v711_v37 }
 0x26e   : > { %v769_v39 = vpop.f32.mrf.mxu1 }
 0x272   : > { %v746_v40 = vpop.f32.mrf.mxu0 }
 0x273   : > { %v770_v41 = vadd.f32 %v769_v39, %v746_v40 }
 0x275   : > { %v775_v43 = vadd.f32 %v1091_v38, %v770_v41 }
 0x277   : > { %v1041_v44 = vmul.f32 -1.442695, %v775_v43 }
 0x279   : > { %1096 = vpow2.f32 %v1041_v44 }
 0x27f   : > { %v1097_v46 = vpop.eup %1096 }
 0x280   : > { %v779_v48 = vadd.f32 1.0, %v1097_v46 }
 0x282   : > { %1098 = vrcp.f32 %v779_v48  ;;  %v791_v52 = vand.u32 2147483648, %v779_v48  ;;  %v789_v54 = vand.u32 2147483647, %v779_v48  ;;  %vm785_vm8 = vweird.f32 %v779_v48 }
 0x284   : > { %v792_v56 = vor.u32 1.1754944e-38, %v791_v52  ;;  %vm790_vm10 = vcmp.eq.f32.partialorder %v789_v54, 8.507059e+37 }
 0x288   : > { %v1099_v49 = vpop.eup %1098 }
 0x289   : > { %v781_v50 = vmul.f32 %v1099_v49, %v779_v48  ;;  %vm786_vm7 = vweird.f32 %v1099_v49 }
 0x28a   : > { %vm787_vm9 = vmor %vm785_vm8, %vm786_vm7 }
 0x28b   : > { %v782_v51 = vsub.f32 1.0, %v781_v50 }
 0x28d   : > { %v783_v53 = vmul.f32 %v1099_v49, %v782_v51 }
 0x28f   : > { %v784_v55 = vadd.f32 %v1099_v49, %v783_v53 }
 0x291   : > { %v788_v57 = vsel %vm787_vm9, %v1099_v49, %v784_v55 }
 0x292   : > { %v793_v58 = vsel %vm790_vm10, %v792_v56, %v788_v57 }
 0x293   : > { %v795_v59 = vmul.f32 %v793_v58, %v715_v34  ;;  %v797_v60 = vsub.f32 1.0, %v793_v58 }
 0x295   : > { %v796_v61 = vadd.f32 %v795_v59, %v715_v34  ;;  %v798_v62 = vmul.f32 %v797_v60, %v711_v37 }
 0x297   : > { %v799_v42 = vadd.f32 %v798_v62, %v796_v61 }
 0x299   : > { %1044 = vmatpush.xpose.msk.msra.mxu3 %vm725_vm6, %v799_v42  ;;  %v806_v47 = vrot.slane %v799_v42, 2 }
 0x29b   : > { %1042 = vmatpush.xpose.msk.msra.mxu2 %vm725_vm6, %v806_v47 }
 0x29c   : > { %1045 = vmatmul.msk.f32.vlgmr.msra.gmra.mxu3 %vm725_vm6, %v800_v29 }
 0x29e   : > { %1043 = vmatmul.msk.f32.vlgmr.msra.gmra.mxu2 %vm725_vm6, %v804_v63 }
 0x31f   : > { %v852_v0 = vpop.f32.mrf.mxu3 }
 0x321   : > { %v828_v2 = vpop.f32.mrf.mxu2 }
 0x322   : > { %v853_v4 = vadd.f32 %v852_v0, %v828_v2 }
 0x324   : > { %v860_v5 = vadd.f32 %v858_v3, %v853_v4 }
 0x326   : > { %883 = vst [vmem:[#allocation1] sm:$0xff] %v860_v5  ;;  %v903_v6 = vrot.slane %v860_v5, 7  ;;  %v863_v7 = vrot.slane %v860_v5, 1 }
 0x328   : > { %vm905_vm12 = vcmp.gt.f32.partialorder %v860_v5, %v903_v6  ;;  %v865_v8 = vmax.f32 %v860_v5, %v863_v7 }
 0x329   : > { %v906_v9 = vsel %vm905_vm12, 1, %v1210_v1 }
 0x32a   : > { %908 = vst.msk [vmem:[#allocation8 - $0x1] sm:$0x2] %vm907_vm11, %v906_v9  ;;  %v866_v10 = vsub.f32 %v860_v5, %v865_v8  ;;  %v870_v11 = vrot.slane %v865_v8, 7 }
 0x32c   : > { %v872_v12 = vsub.f32 %v860_v5, %v870_v11  ;;  %v867_v13 = vmul.f32 1.442695, %v866_v10 }
 0x32d   : > { %v885_v1 = vld [vmem:[#allocation1 + $0x1] ss:$9 sm:$0xff] }
 0x32e   : > { %v873_v14 = vmul.f32 1.442695, %v872_v12  ;;  %v887_v23 = vsel %vm882_vm13, %v885_v1, %v860_v5 }
 0x330   : > { %1100 = vpow2.f32 %v873_v14 }
 0x331   : > { %1102 = vpow2.f32 %v867_v13 }
 0x336   : > { %v1101_v15 = vpop.eup %1100 }
 0x337   : > { %v876_v16 = vrot.slane %v1101_v15, 1  ;;  %v1103_v17 = vpop.eup %1102 }
 0x339   : > { %v878_v18 = vadd.f32 %v1103_v17, %v876_v16 }
 0x33b   : > { %1104 = vlog2.f32 %v878_v18 }
 0x33c   : > { %1106 = vrcp.f32 %v1212_v26 }
 0x341   : > { %v1105_v20 = vpop.eup %1104 }
 0x342   : > { %v880_v21 = vmul.f32 0.6931472, %v1105_v20  ;;  %v1107_v27 = vpop.eup %1106 }
 0x343   : > { %v894_v28 = vmul.f32 2.0, %v1107_v27  ;;  %vm898_vm15 = vweird.f32 %v1107_v27 }
 0x344   : > { %v881_v22 = vadd.f32 %v880_v21, %v865_v8 }
 0x345   : > { %v895_v29 = vsub.f32 1.0, %v894_v28 }
 0x346   : > { %v888_v24 = vsub.f32 %v881_v22, %v887_v23 }
 0x347   : > { %v896_v30 = vmul.f32 %v1107_v27, %v895_v29 }
 0x348   : > { %v890_v25 = vsel %vm889_vm14, %v888_v24, 0.0 }
 0x349   : > { %891 = vadd.xlane.f32.xlu2 %v890_v25  ;;  %v897_v31 = vadd.f32 %v1107_v27, %v896_v30 }
 0x34b   : > { %v899_v32 = vsel %vm898_vm15, %v1107_v27, %v897_v31 }
 0x3bc   : > { %v892_v33 = vpop.xlane.xlu2 %891 }
 0x3bd   : > { %v900_v34 = vmul.f32 %v899_v32, %v892_v33 }
 0x3bf   : > { %902 = vst.msk [vmem:[#allocation6] sm:$0x1] %vm901_vm0, %v900_v34 }
 0x3c0 PF: > { %p1068_p7 = scmp.eq.s32.totalorder %s1287_s0, 2  ;;  %s1213_s28 = smov [#allocation6]  }
 0x3c1   : > { %s915_s29 = sshll.u32 %s1213_s28, 4  ;;  %s917_s13 = sshll.u32 %s1458_s10, 4  ;;  %s916_s29 = int_to_ptr.vmem [resolvable:$true] %s915_s29  ;;  %s918_s13 = int_to_ptr.hbm [resolvable:$true] %s917_s13 }
 0x3c2   : > { %1061 = dma.vmem_to_hbm [thread:$0]  (%p1068_p7), %s916_s29, 16, %s918_s13, [#allocation7]  }
 0x3c3   : > { %s929_s16 = sshll.u32 %s1459_s11, 4  ;;  %s1214_s17 = smov [#allocation8]   ;;  %s930_s16 = int_to_ptr.hbm [resolvable:$true] %s929_s16 }
 0x3c4   : > { %s927_s18 = sshll.u32 %s1214_s17, 4  ;;  %s928_s18 = int_to_ptr.vmem [resolvable:$true] %s927_s18 }
 0x3c5   : > { %1063 = dma.vmem_to_hbm [thread:$0]  (%p1068_p7), %s928_s18, 16, %s930_s16, [#allocation9]  }
 0x3c6   : > { %1195 = dma.done.wait (%p1068_p7), [#allocation7], 16  }
 0x3c7   : > { %1197 = vsyncadd (%p1068_p7), [#allocation7], 4294967280 }
 0x3c8   : > { %1199 = dma.done.wait (%p1068_p7), [#allocation9], 16  }
 0x3c9   : > { %1201 = vsyncadd (%p1068_p7), [#allocation9], 4294967280 }
 0x3ca PF: > { %s37_s25 = sadd.s32 1, %s1204_s25  }
 0x3cb   : > { %p34_p8 = scmp.ge.s32.totalorder %s37_s25, 5  }
 0x3cd   :  { %36 = sbr.rel (!%p34_p8) target bundleno = 9 (0x9), region = 100 }
 0x3d2   :  { %948 = vsyncpa [#allocation7], 1 }
 0x3d3   :  { %950 = vsyncpa [#allocation7 + $0x1], 1 }
 0x3d4   :  { %951 = vsyncpa [#allocation9], 1 }

</bundles_post_ra>
